<compile_context>
chip_gen: v7x
topology: tpu7x:2x2x1
jax: 0.10.0
libtpu: 0.0.40
codegen_flags: <defaults>
</compile_context>

<pallas_src>
from functools import partial

import jax
import jax.numpy as jnp
from jax.experimental import pallas as pl
from jax.experimental.pallas import tpu as pltpu


def _waveact_kernel(p_ref, x_ref, o_ref):
    # p_ref: SMEM (2,) float32 = [R, phi]; computes R * sin(x + phi)
    # which equals w1*sin(x) + w2*cos(x).
    r = p_ref[0]
    phi = p_ref[1]
    x = x_ref[...].astype(jnp.float32)
    # TODO(synk): if a bundle dump shows VALU saturation on v6e/v7x, replace
    # jnp.sin with a reduced-range minimax polynomial (sin is not an EUP op).
    o_ref[...] = (r * jnp.sin(x + phi)).astype(o_ref.dtype)


def _round_up(a, b):
    return ((a + b - 1) // b) * b


def _tpu_generation():
    try:
        kind = jax.devices()[0].device_kind.lower()
    except Exception:
        return "unknown"
    if "v7" in kind:
        return "v7x"
    if "v6" in kind:
        return "v6e"
    if "v5" in kind:
        return "v5e"
    return "unknown"


# generation -> (block_bytes, min_steps, even_steps, scoped_vmem_default, physical_vmem)
_TILING = {
    "v7x":     (4 << 20, 4, True,  32 << 20, 64 << 20),
    "v6e":     (4 << 20, 2, False, 32 << 20, 128 << 20),
    "v5e":     (2 << 20, 2, False, 16 << 20, 128 << 20),
    "unknown": (2 << 20, 2, False, 16 << 20, 64 << 20),
}


def _waveact_forward(min_pallas_elems, target_block_bytes, x, w1f, w2f):
    dtype = x.dtype
    n = x.size
    gen = _tpu_generation()
    block_bytes_default, min_steps, even_steps, scoped_vmem, physical_vmem = _TILING[gen]

    if min_pallas_elems is None:
        min_pallas_elems = (1 << 20) if gen == "v7x" else (1 << 18)
    if target_block_bytes is None:
        target_block_bytes = block_bytes_default

    if n == 0 or n < min_pallas_elems:
        # Small-input fast path: launch/reshape overhead dwarfs compute;
        # plain XLA fuses this into neighbours for free.
        xf = x.astype(jnp.float32)
        return (w1f * jnp.sin(xf) + w2f * jnp.cos(xf)).astype(dtype)

    orig_shape = x.shape
    itemsize = jnp.dtype(dtype).itemsize
    sublane = {4: 8, 2: 16, 1: 32}.get(itemsize, 8)

    # Lane-dense 2D view: widest lane count (multiple of 128) dividing n.
    lane = None
    for c in (2048, 1024, 512, 256, 128):
        if n % c == 0:
            lane = c
            break
    pad = 0
    if lane is None:
        # No multiple of 128 divides n: pad the flat array ONCE to a multiple
        # of 1024 rather than running every block with masked partial stores.
        lane = 1024
        pad = (-n) % lane

    rows = (n + pad) // lane
    x_flat = x.reshape(-1)
    if pad:
        x_flat = jnp.pad(x_flat, (0, pad))
    x2d = x_flat.reshape(rows, lane)

    # Block sizing: the VMEM cap picks tile_rows; then enforce a small
    # per-generation minimum step count (2 single-TC, 4 & even on v7x).
    rows_aligned = _round_up(rows, sublane)
    max_rows_by_vmem = max(
        sublane,
        (target_block_bytes // (lane * itemsize)) // sublane * sublane,
    )
    tile_rows = min(max_rows_by_vmem, rows_aligned)

    steps = pl.cdiv(rows, tile_rows)
    if steps < min_steps and rows_aligned > sublane:
        tile_rows = min(
            tile_rows,
            max(sublane, _round_up(pl.cdiv(rows, min_steps), sublane)),
        )
        steps = pl.cdiv(rows, tile_rows)
    if even_steps and steps > 1 and steps % 2 == 1:
        # v7x: make the "parallel" axis split evenly across the 2 TensorCores.
        tile_rows = max(sublane, _round_up(pl.cdiv(rows, steps + 1), sublane))
        steps = pl.cdiv(rows, tile_rows)

    grid = (steps,)

    # in + out blocks, each double-buffered.
    live_bytes = 4 * tile_rows * lane * itemsize
    cp_kwargs = dict(dimension_semantics=("parallel",))
    if live_bytes > scoped_vmem - (2 << 20):
        cp_kwargs["vmem_limit_bytes"] = int(
            min(live_bytes + (4 << 20), physical_vmem - (8 << 20))
        )
    compiler_params = pltpu.CompilerParams(**cp_kwargs)

    # Fold the two scalars: w1*sin(x) + w2*cos(x) = R*sin(x + phi).
    r = jnp.sqrt(w1f * w1f + w2f * w2f)
    phi = jnp.arctan2(w2f, w1f)
    p = jnp.stack([r, phi])

    out2d = pl.pallas_call(
        _waveact_kernel,
        out_shape=jax.ShapeDtypeStruct((rows, lane), dtype),
        grid_spec=pltpu.PrefetchScalarGridSpec(
            num_scalar_prefetch=0,
            grid=grid,
            in_specs=[
                pl.BlockSpec(memory_space=pltpu.SMEM),              # [R, phi]
                pl.BlockSpec((tile_rows, lane), lambda i: (i, 0)),
            ],
            out_specs=pl.BlockSpec((tile_rows, lane), lambda i: (i, 0)),
        ),
        compiler_params=compiler_params,
    )(p, x2d)

    out_flat = out2d.reshape(-1)
    if pad:
        out_flat = out_flat[:n]
    return out_flat.reshape(orig_shape)


@partial(jax.custom_vjp, nondiff_argnums=(0, 1))
def _waveact_core(min_pallas_elems, target_block_bytes, x, w1f, w2f):
    return _waveact_forward(min_pallas_elems, target_block_bytes, x, w1f, w2f)


def _waveact_core_fwd(min_pallas_elems, target_block_bytes, x, w1f, w2f):
    out = _waveact_forward(min_pallas_elems, target_block_bytes, x, w1f, w2f)
    return out, (x, w1f, w2f)


def _waveact_core_bwd(min_pallas_elems, target_block_bytes, res, g):
    # Backward is plain XLA (memory-bound elementwise + two reductions) and is
    # written directly in terms of w1/w2 so it is smooth even at w1=w2=0.
    x, w1f, w2f = res
    xf = x.astype(jnp.float32)
    gf = g.astype(jnp.float32)
    s = jnp.sin(xf)
    c = jnp.cos(xf)
    dx = (gf * (w1f * c - w2f * s)).astype(x.dtype)
    dw1 = jnp.sum(gf * s).astype(jnp.float32)
    dw2 = jnp.sum(gf * c).astype(jnp.float32)
    return dx, dw1, dw2


_waveact_core.defvjp(_waveact_core_fwd, _waveact_core_bwd)


def waveact(x, w1, w2, *, min_pallas_elems=None, target_block_bytes=None):
    """WaveAct forward: w1*sin(x) + w2*cos(x); same shape/dtype as x."""
    # Learnable scalars straight to f32 (never round through bf16).
    w1f = jnp.asarray(w1, jnp.float32).reshape(())
    w2f = jnp.asarray(w2, jnp.float32).reshape(())
    return _waveact_core(min_pallas_elems, target_block_bytes, x, w1f, w2f)


if __name__ == "__main__":
    key = jax.random.PRNGKey(0)
    k1, k2, k3 = jax.random.split(key, 3)

    # Parameters match nn.Parameter(torch.ones(1)).
    w1 = jnp.ones((), dtype=jnp.float32)
    w2 = jnp.ones((), dtype=jnp.float32)

    # 1) PINNsformer-style small input (batch=2, seq=8, hidden=32): fast path.
    x_small = jax.random.normal(k1, (2, 8, 32), dtype=jnp.float32)
    ref_small = w1 * jnp.sin(x_small) + w2 * jnp.cos(x_small)
    out_small = jax.block_until_ready(waveact(x_small, w1, w2))
    assert out_small.shape == x_small.shape and out_small.dtype == x_small.dtype
    assert jnp.allclose(out_small, ref_small, atol=1e-5, rtol=1e-5)

    # 1b) Same small input forced through the Pallas kernel path.
    out_small_pl = jax.block_until_ready(
        waveact(x_small, w1, w2, min_pallas_elems=0))
    assert jnp.allclose(out_small_pl, ref_small, atol=1e-5, rtol=1e-5)

    # 2) Larger input that takes the Pallas path by default on v5e/v6e
    #    (lane=1024, rows=257 -> ragged masked last block, no padding).
    x_big = jax.random.normal(k2, (2, 257, 512), dtype=jnp.float32)
    ref_big = w1 * jnp.sin(x_big) + w2 * jnp.cos(x_big)
    out_big = jax.block_until_ready(waveact(x_big, w1, w2, min_pallas_elems=0))
    assert out_big.shape == x_big.shape and out_big.dtype == x_big.dtype
    assert jnp.allclose(out_big, ref_big, atol=1e-5, rtol=1e-5)

    # 3) Awkward size (1001 elements, not a multiple of 128) forced through
    #    the Pallas path: exercises the one-time flat pad fallback.
    x_odd = jax.random.normal(k3, (7, 13, 11), dtype=jnp.float32)
    ref_odd = w1 * jnp.sin(x_odd) + w2 * jnp.cos(x_odd)
    out_odd = jax.block_until_ready(waveact(x_odd, w1, w2, min_pallas_elems=0))
    assert out_odd.shape == x_odd.shape and out_odd.dtype == x_odd.dtype
    assert jnp.allclose(out_odd, ref_odd, atol=1e-5, rtol=1e-5)

    # 4) Gradients flow through the custom VJP (Pallas path included).
    def loss(w1_, w2_):
        return jnp.sum(waveact(x_small, w1_, w2_, min_pallas_elems=0))

    g1, g2 = jax.grad(loss, argnums=(0, 1))(w1, w2)
    g1 = jax.block_until_ready(g1)
    assert jnp.allclose(g1, jnp.sum(jnp.sin(x_small)), atol=1e-3, rtol=1e-4)
    assert jnp.allclose(g2, jnp.sum(jnp.cos(x_small)), atol=1e-3, rtol=1e-4)

    print("KERNEL_OK")
</pallas_src>

<mosaic_0001>
module attributes {stable_mosaic.version = 11 : i64} {
  func.func @_waveact_kernel(%arg0: i32, %arg1: memref<2xf32, #tpu.memory_space<smem>>, %arg2: memref<8x512xf32, #tpu.memory_space<vmem>>, %arg3: memref<8x512xf32, #tpu.memory_space<vmem>>) attributes {dimension_semantics = [#tpu.dimension_semantics<parallel>], iteration_bounds = array<i64: 1>, scalar_prefetch = 0 : i64, scratch_operands = 0 : i64, tpu.core_type = #tpu.core_type<tc>, window_params = [{transform_indices = @transform_0, window_bounds = array<i64: 2>}, {transform_indices = @transform_1, window_bounds = array<i64: 8, 512>}, {transform_indices = @transform_2, window_bounds = array<i64: 8, 512>}]} {
    %c0 = arith.constant 0 : index
    %0 = memref.load %arg1[%c0] : memref<2xf32, #tpu.memory_space<smem>>
    %c1 = arith.constant 1 : index
    %1 = memref.load %arg1[%c1] : memref<2xf32, #tpu.memory_space<smem>>
    %c0_0 = arith.constant 0 : index
    %c0_1 = arith.constant 0 : index
    %2 = vector.load %arg2[%c0_0, %c0_1] : memref<8x512xf32, #tpu.memory_space<vmem>>, vector<8x512xf32>
    %3 = vector.broadcast %1 : f32 to vector<8x512xf32>
    %4 = arith.addf %2, %3 : vector<8x512xf32>
    %5 = math.sin %4 : vector<8x512xf32>
    %6 = vector.broadcast %0 : f32 to vector<8x512xf32>
    %7 = arith.mulf %6, %5 : vector<8x512xf32>
    %c0_2 = arith.constant 0 : index
    %c0_3 = arith.constant 0 : index
    %8 = vector.load %arg3[%c0_2, %c0_3] : memref<8x512xf32, #tpu.memory_space<vmem>>, vector<8x512xf32>
    tpu.vector_store %arg3[%c0_2, %c0_3], %7 {strides = array<i32>} : memref<8x512xf32, #tpu.memory_space<vmem>>, vector<8x512xf32>,
    return
  }
  func.func @transform_0(%arg0: i32) -> i32 {
    %c0_i32 = arith.constant 0 : i32
    %c0_i32_0 = arith.constant 0 : i32
    return %c0_i32 : i32
  }
  func.func @transform_1(%arg0: i32) -> (i32, i32) {
    %c0_i32 = arith.constant 0 : i32
    %c0_i32_0 = arith.constant 0 : i32
    return %arg0, %c0_i32 : i32, i32
  }
  func.func @transform_2(%arg0: i32) -> (i32, i32) {
    %c0_i32 = arith.constant 0 : i32
    %c0_i32_0 = arith.constant 0 : i32
    return %arg0, %c0_i32 : i32, i32
  }
}

</mosaic_0001>

<bundles_post_ra>
// kernel: tpu_custom_call.1
= control target key start
LH: loop header
LB: loop body
LE: loop exit
PB: predicated region body
PF: predicated region fallthrough
CT: control target
= control target key end

     0   :  { %7 = vsyncpa [#allocation5], 0  ;;  %s1866_s0 = inlined_call_operand.hbm [shape: f32[2], index: 0, kind: input, shape index: {}]   ;;  %s1867_s1 = inlined_call_operand.hbm [shape: f32[1,512], index: 1, kind: input, shape index: {}]   ;;  %s1868_s2 = inlined_call_operand.hbm [shape: f32[1,512], index: 2, kind: output, shape index: {}]  }
   0x1   :  { %8 = vsyncpa [#allocation3], 0 }
   0x2   :  { %9 = vsyncpa [#allocation4], 0  ;;  %s1035_s11 = scalar_lea.hbm %s1866_s0, 16 }
   0x3   :  { %p1036_p0 = scmp.ne.s32.totalorder %s1866_s0, %s1035_s11  ;;  %p1039_p1 = scmp.lt.u32.totalorder %s1035_s11, %s1866_s0 }
   0x5   :  { %p1041_p2 = pnand %p1039_p1, %p1036_p0 }
   0x7   :  { %1044 = shalt.err (!%p1041_p2)
}
   0x8   :  { %s1095_s16 = smov [#allocation2]  }
   0x9   :  { %17 = dma.hbm_to_smem %s1866_s0, 16, %s1095_s16, [#allocation5]  }
   0xa   :  { %22 = vsyncadd [#allocation3], 448  ;;  %s1096_s19 = smov [#allocation6]   ;;  %s1045_s23 = scalar_lea.hbm %s1867_s1, 64 }
   0xb   :  { %s23_s20 = sshll.u32 %s1096_s19, 4  ;;  %p1046_p3 = scmp.ne.s32.totalorder %s1867_s1, %s1045_s23  ;;  %s24_s20 = int_to_ptr.vmem [resolvable:$true] %s23_s20 }
   0xc   :  { %p1049_p4 = scmp.lt.u32.totalorder %s1045_s23, %s1867_s1 }
   0xe   :  { %p1051_p5 = pnand %p1049_p4, %p1046_p3 }
  0x10   :  { %1054 = shalt.err (!%p1051_p5)
}
  0x11   :  { %s1055_s28 = scalar_lea.vmem %s24_s20, 64  ;;  %s1059_s0 = scalar_lea.vmem %s24_s20, 512 }
  0x12   :  { %p1056_p6 = scmp.ne.s32.totalorder %s24_s20, %s1055_s28  ;;  %p1060_p7 = scmp.lt.s32.totalorder %s24_s20, %s24_s20 }
  0x13   :  { %p1061_p8 = scmp.lt.s32.totalorder %s1059_s0, %s1055_s28 }
  0x15   :  { %p1062_p9 = por %p1061_p8, %p1060_p7 }
  0x17   :  { %p1063_p10 = pnand %p1062_p9, %p1056_p6 }
  0x19   :  { %1066 = shalt.err (!%p1063_p10)
}
  0x1a   :  { %s1097_s29 = smov 64   ;;  %s1098_s30 = smov 4  }
  0x1b   :  { %29 = dma.hbm_to_vmem [thread:$0]  %s1867_s1, 64, %s24_s20, [#allocation3], %s1097_s29, %s1097_s29, %s1098_s30  }
  0x1c   :  { %1089 = dma.done.wait [#allocation5], 16  }
  0x1d   :  { %1090 = vsyncadd [#allocation5], 4294967280 }
  0x1e   :  { %1091 = dma.done.wait [#allocation3], 512  }
  0x1f   :  { %1092 = vsyncadd [#allocation3], 4294966784 }
  0x20   :  { %36 = sfence }
  0x21   :  { %s927_s5 = sld [smem:[#allocation2 + $0x1]]  ;;  %v39_v0 = vld [vmem:[#allocation6] sm:$0xf]  ;;  %v40_v1 = vld [vmem:[#allocation6 + $0x4] sm:$0xf]  ;;  %s1684_s1 = sld [smem:[#allocation2]] }
  0x22   :  { %v41_v2 = vld [vmem:[#allocation6 + $0x8] sm:$0xf]  ;;  %v1099_v34 = vmov 683565275   ;;  %v1100_v36 = vmov 2475754826  }
  0x23   :  { %v1101_v38 = vmov 2131351028   ;;  %v1102_v40 = vmov 2102212464   ;;  %v1103_v42 = vmov 920167782  }
  0x24   :  { %v1104_v50 = vmov 1326507024  }
  0x27   :  { %v1148_v3 = vstv %s927_s5 }
  0x28   :  { %v1151_v4 = vadd.f32 %v1148_v3, %v39_v0  ;;  %v1154_v5 = vadd.f32 %v1148_v3, %v40_v1  ;;  %v1157_v6 = vadd.f32 %v1148_v3, %v41_v2 }
  0x2a   :  { %v56_v7 = vand.u32 2147483647, %v1151_v4  ;;  %v59_v8 = vand.u32 2139095040, %v1151_v4  ;;  %v160_v9 = vand.u32 2147483647, %v1154_v5  ;;  %v163_v10 = vand.u32 2139095040, %v1154_v5 }
  0x2b   :  { %v267_v15 = vand.u32 2139095040, %v1157_v6  ;;  %v264_v28 = vand.u32 2147483647, %v1157_v6 }
  0x2c   :  { %v60_v11 = vshrl.u32 %v59_v8, 23  ;;  %v63_v12 = vand.u32 8388607, %v56_v7  ;;  %v164_v13 = vshrl.u32 %v163_v10, 23  ;;  %v167_v14 = vand.u32 8388607, %v160_v9 }
  0x2d   :  { %v268_v18 = vshrl.u32 %v267_v15, 23 }
  0x2e   :  { %v928_v16 = vadd.s32 4294967169, %v60_v11  ;;  %v932_v17 = vadd.s32 4294967169, %v164_v13  ;;  %v64_v20 = vor.u32 8388608, %v63_v12  ;;  %v168_v21 = vor.u32 8388608, %v167_v14 }
  0x2f   :  { %v936_v23 = vadd.s32 4294967169, %v268_v18 }
  0x30   :  { %v66_v19 = vadd.s32 1, %v928_v16  ;;  %v170_v22 = vadd.s32 1, %v932_v17  ;;  %v1169_v29 = vshll.u32 %v64_v20, 8  ;;  %v1171_v31 = vshll.u32 %v168_v21, 8 }
  0x31   :  { %v1173_v32 = vadd.s32 1, %v936_v23 }
  0x32   :  { %vm67_vm0 = vcmp.gt.s32.totalorder %v66_v19, 0  ;;  %vm171_vm1 = vcmp.gt.s32.totalorder %v170_v22, 0 }
  0x33   :  { %v68_v24 = vsel %vm67_vm0, %v66_v19, 0  ;;  %v172_v27 = vsel %vm171_vm1, %v170_v22, 0  ;;  %vm275_vm6 = vcmp.gt.s32.totalorder %v1173_v32, 0 }
  0x34   :  { %v69_v25 = vshrl.u32 %v68_v24, 5  ;;  %v70_v26 = vand.u32 31, %v68_v24  ;;  %v174_v30 = vand.u32 31, %v172_v27  ;;  %v1180_v44 = vshrl.u32 %v172_v27, 5 }
  0x36   :  { %v71_v33 = vsub.s32 32, %v70_v26  ;;  %v73_v35 = vshll.u32 %v1099_v34, %v70_v26  ;;  %v76_v37 = vshll.u32 %v1100_v36, %v70_v26  ;;  %v79_v39 = vshll.u32 %v1101_v38, %v70_v26 }
  0x37   :  { %v82_v41 = vshll.u32 %v1102_v40, %v70_v26  ;;  %v85_v43 = vshll.u32 %v1103_v42, %v70_v26  ;;  %vm88_vm2 = vcmp.lt.s32.totalorder %v69_v25, 1  ;;  %vm89_vm3 = vcmp.lt.s32.totalorder %v69_v25, 2 }
  0x38   :  { %v72_v45 = vshrl.u32 %v1099_v34, %v71_v33  ;;  %v74_v46 = vshrl.u32 %v1100_v36, %v71_v33  ;;  %v77_v47 = vshrl.u32 %v1101_v38, %v71_v33  ;;  %v80_v48 = vshrl.u32 %v1102_v40, %v71_v33 }
  0x39   :  { %v83_v49 = vshrl.u32 %v1103_v42, %v71_v33  ;;  %v86_v51 = vshrl.u32 %v1104_v50, %v71_v33  ;;  %vm91_vm4 = vcmp.lt.s32.totalorder %v69_v25, 4  ;;  %v175_v55 = vsub.s32 32, %v174_v30 }
  0x3a   :  { %v75_v52 = vor.u32 %v74_v46, %v73_v35  ;;  %v78_v53 = vor.u32 %v77_v47, %v76_v37  ;;  %v81_v54 = vor.u32 %v80_v48, %v79_v39  ;;  %vm90_vm5 = vcmp.lt.s32.totalorder %v69_v25, 3 }
  0x3b   :  { %v84_v56 = vor.u32 %v83_v49, %v82_v41  ;;  %v87_v57 = vor.u32 %v86_v51, %v85_v43  ;;  %v177_v58 = vshll.u32 %v1099_v34, %v174_v30  ;;  %v180_v2 = vshll.u32 %v1100_v36, %v174_v30 }
  0x3c   :  { %v92_v59 = vsel %vm88_vm2, %v72_v45, %v75_v52  ;;  %v93_v60 = vsel %vm91_vm4, %v81_v54, 2102212464  ;;  %v96_v61 = vsel %vm88_vm2, %v75_v52, %v78_v53  ;;  %v100_v62 = vsel %vm88_vm2, %v78_v53, %v81_v54 }
  0x3d   :  { %v94_v63 = vsel %vm90_vm5, %v78_v53, %v93_v60  ;;  %v97_v0 = vsel %vm91_vm4, %v84_v56, 920167782  ;;  %v101_v1 = vsel %vm91_vm4, %v87_v57, 1326507024  ;;  %v176_v11 = vshrl.u32 %v1099_v34, %v175_v55 }
  0x3e   :  { %v98_v8 = vsel %vm90_vm5, %v81_v54, %v97_v0  ;;  %v102_v10 = vsel %vm90_vm5, %v84_v56, %v101_v1  ;;  %v178_v12 = vshrl.u32 %v1100_v36, %v175_v55  ;;  %v95_v13 = vsel %vm89_vm3, %v92_v59, %v94_v63  ;;  %v42_v54 = vld [vmem:[#allocation6 + $0xc] sm:$0xf] }
  0x3f   :  { %v99_v14 = vsel %vm89_vm3, %v96_v61, %v98_v8  ;;  %v103_v15 = vsel %vm89_vm3, %v100_v62, %v102_v10  ;;  %v181_v16 = vshrl.u32 %v1101_v38, %v175_v55  ;;  %v183_v23 = vshll.u32 %v1101_v38, %v174_v30 }
  0x40   :  { %v1201_v17 = vmul.u32.u64.low %v1169_v29, %v103_v15  ;;  %v1202_v18 = vmul.u32.u64.high %v1169_v29, %v103_v15, %v1201_v17  ;;  %v1205_v19 = vmul.u32.u64.low %v1169_v29, %v99_v14  ;;  %v1206_v20 = vmul.u32.u64.high %v1169_v29, %v99_v14, %v1205_v19 }
  0x41   :  { %v179_v21 = vor.u32 %v178_v12, %v177_v58  ;;  %v182_v22 = vor.u32 %v181_v16, %v180_v2  ;;  %v184_v24 = vshrl.u32 %v1102_v40, %v175_v55  ;;  %v186_v25 = vshll.u32 %v1102_v40, %v174_v30 }
  0x42   :  { %v187_v26 = vshrl.u32 %v1103_v42, %v175_v55  ;;  %v189_v27 = vshll.u32 %v1103_v42, %v174_v30  ;;  %v190_v33 = vshrl.u32 %v1104_v50, %v175_v55  ;;  %v111_v35 = vmul.u32 %v1169_v29, %v95_v13 }
  0x43   :  { %v185_v37 = vor.u32 %v184_v24, %v183_v23  ;;  %vm192_vm7 = vcmp.lt.s32.totalorder %v1180_v44, 1  ;;  %vm193_vm8 = vcmp.lt.s32.totalorder %v1180_v44, 2  ;;  %vm113_vm9 = vc.u32 %v1202_v18, %v1205_v19 }
  0x44   :  { %v114_v39 = vadd.s32 1, %v1206_v20  ;;  %v188_v41 = vor.u32 %v187_v26, %v186_v25  ;;  %vm194_vm10 = vcmp.lt.s32.totalorder %v1180_v44, 3  ;;  %v191_v43 = vor.u32 %v190_v33, %v189_v27 }
  0x45   :  { %vm195_vm11 = vcmp.lt.s32.totalorder %v1180_v44, 4  ;;  %v196_v30 = vsel %vm192_vm7, %v176_v11, %v179_v21  ;;  %v200_v45 = vsel %vm192_vm7, %v179_v21, %v182_v22  ;;  %v204_v48 = vsel %vm192_vm7, %v182_v22, %v185_v37 }
  0x46   :  { %v115_v29 = vsel %vm113_vm9, %v114_v39, %v1206_v20  ;;  %v197_v46 = vsel %vm195_vm11, %v185_v37, 2102212464  ;;  %v201_v47 = vsel %vm195_vm11, %v188_v41, 920167782  ;;  %v205_v53 = vsel %vm195_vm11, %v191_v43, 1326507024 }
  0x47   :  { %v116_v49 = vadd.s32 %v115_v29, %v111_v35  ;;  %v198_v51 = vsel %vm194_vm10, %v182_v22, %v197_v46  ;;  %v202_v52 = vsel %vm194_vm10, %v185_v37, %v201_v47  ;;  %v206_v57 = vsel %vm194_vm10, %v188_v41, %v205_v53 }
  0x48   :  { %v199_v55 = vsel %vm193_vm8, %v196_v30, %v198_v51  ;;  %v203_v56 = vsel %vm193_vm8, %v200_v45, %v202_v52  ;;  %v276_v58 = vsel %vm275_vm6, %v1173_v32, 0  ;;  %v207_v60 = vsel %vm193_vm8, %v204_v48, %v206_v57 }
  0x49   :  { %v117_v59 = vadd.s32 536870912, %v116_v49  ;;  %v1240_v61 = vmul.u32.u64.low %v1171_v31, %v203_v56  ;;  %v1241_v62 = vmul.u32.u64.high %v1171_v31, %v203_v56, %v1240_v61  ;;  %v271_v1 = vand.u32 8388607, %v264_v28 }
  0x4a   :  { %v1245_v63 = vmul.u32.u64.low %v1171_v31, %v207_v60  ;;  %v1246_v0 = vmul.u32.u64.high %v1171_v31, %v207_v60, %v1245_v63  ;;  %v1251_v2 = vadd.f32 %v1148_v3, %v42_v54  ;;  %v278_v8 = vand.u32 31, %v276_v58 }
  0x4b   :  { %v1253_v32 = vshrl.u32 %v117_v59, 30  ;;  %v215_v44 = vmul.u32 %v1171_v31, %v199_v55  ;;  %v218_v11 = vadd.s32 1, %v1241_v62  ;;  %v272_v13 = vor.u32 8388608, %v271_v1 }
  0x4c   :  { %v279_v12 = vsub.s32 32, %v278_v8  ;;  %vm217_vm12 = vc.u32 %v1246_v0, %v1240_v61  ;;  %v277_v16 = vshrl.u32 %v276_v58, 5  ;;  %v371_v17 = vand.u32 2139095040, %v1251_v2 }
  0x4d   :  { %v119_v10 = vshll.u32 %v1253_v32, 30  ;;  %v219_v15 = vsel %vm217_vm12, %v218_v11, %v1241_v62  ;;  %v281_v21 = vshll.u32 %v1099_v34, %v278_v8  ;;  %v284_v22 = vshll.u32 %v1100_v36, %v278_v8 }
  0x4e   :  { %v220_v20 = vadd.s32 %v219_v15, %v215_v44  ;;  %v282_v31 = vshrl.u32 %v1100_v36, %v279_v12  ;;  %v285_v24 = vshrl.u32 %v1101_v38, %v279_v12  ;;  %v287_v25 = vshll.u32 %v1101_v38, %v278_v8  ;;  %v43_v44 = vld [vmem:[#allocation6 + $0x10] sm:$0xf] }
  0x4f   :  { %v1260_v14 = vsub.s32 %v116_v49, %v119_v10  ;;  %v288_v26 = vshrl.u32 %v1102_v40, %v279_v12  ;;  %v290_v33 = vshll.u32 %v1102_v40, %v278_v8  ;;  %v1272_v35 = vshll.u32 %v272_v13, 8 }
  0x50   :  { %v221_v27 = vadd.s32 536870912, %v220_v20  ;;  %v291_v39 = vshrl.u32 %v1103_v42, %v279_v12  ;;  %vm299_vm13 = vcmp.lt.s32.totalorder %v277_v16, 4  ;;  %v372_v41 = vshrl.u32 %v371_v17, 23 }
  0x51   :  { %v122_v23 = vsub.s32 0, %v1260_v14  ;;  %v280_v30 = vshrl.u32 %v1099_v34, %v279_v12  ;;  %v293_v45 = vshll.u32 %v1103_v42, %v278_v8  ;;  %v294_v29 = vshrl.u32 %v1104_v50, %v279_v12 }
  0x52   :  { %v1276_v43 = vshrl.u32 %v221_v27, 30  ;;  %v283_v47 = vor.u32 %v282_v31, %v281_v21  ;;  %v286_v48 = vor.u32 %v285_v24, %v284_v22  ;;  %v289_v49 = vor.u32 %v288_v26, %v287_v25 }
  0x53   :  { %v929_v37 = vmin.u32 %v122_v23, %v1260_v14  ;;  %v292_v52 = vor.u32 %v291_v39, %v290_v33  ;;  %vm296_vm14 = vcmp.lt.s32.totalorder %v277_v16, 1  ;;  %vm298_vm15 = vcmp.lt.s32.totalorder %v277_v16, 3 }
  0x54   :  { %v223_v51 = vshll.u32 %v1276_v43, 30  ;;  %v112_v53 = vadd.s32 %v1205_v19, %v1202_v18  ;;  %v295_v55 = vor.u32 %v294_v29, %v293_v45  ;;  %v301_v56 = vsel %vm299_vm13, %v289_v49, 2102212464 }
  0x55   :  { %v124_v46 = vclz %v929_v37  ;;  %vm297_vm0 = vcmp.lt.s32.totalorder %v277_v16, 2  ;;  %v305_v58 = vsel %vm299_vm13, %v292_v52, 920167782  ;;  %v940_v59 = vadd.s32 4294967169, %v372_v41 }
  0x56   :  { %v1285_v57 = vsub.s32 %v220_v20, %v223_v51  ;;  %v300_v60 = vsel %vm296_vm14, %v280_v30, %v283_v47  ;;  %v304_v62 = vsel %vm296_vm14, %v283_v47, %v286_v48  ;;  %v306_v63 = vsel %vm298_vm15, %v289_v49, %v305_v58 }
  0x57   :  { %v930_v54 = vadd.s32 4294967294, %v124_v46  ;;  %v302_v19 = vsel %vm298_vm15, %v286_v48, %v301_v56  ;;  %v308_v8 = vsel %vm296_vm14, %v286_v48, %v289_v49  ;;  %v309_v13 = vsel %vm299_vm13, %v295_v55, 1326507024 }
  0x58   :  { %v226_v18 = vsub.s32 0, %v1285_v57  ;;  %v307_v17 = vsel %vm297_vm0, %v304_v62, %v306_v63  ;;  %v310_v20 = vsel %vm298_vm15, %v292_v52, %v309_v13  ;;  %v378_v23 = vadd.s32 1, %v940_v59 }
  0x59   :  { %vm931_vm1 = vcmp.lt.s32.totalorder %v930_v54, 0  ;;  %v311_v22 = vsel %vm297_vm0, %v308_v8, %v310_v20  ;;  %v1301_v24 = vadd.f32 %v1148_v3, %v43_v44  ;;  %v368_v26 = vand.u32 2147483647, %v1251_v2 }
  0x5a   :  { %v127_v1 = vsel %vm931_vm1, 0, %v930_v54  ;;  %v933_v15 = vmin.u32 %v226_v18, %v1285_v57  ;;  %v1306_v37 = vmul.u32.u64.low %v1272_v35, %v311_v22  ;;  %v1307_v39 = vmul.u32.u64.high %v1272_v35, %v311_v22, %v1306_v37 }
  0x5b   :  { %v128_v10 = vsub.s32 32, %v127_v1  ;;  %v129_v11 = vshll.u32 %v1260_v14, %v127_v1  ;;  %v132_v12 = vsub.s32 4294967266, %v127_v1  ;;  %v303_v14 = vsel %vm297_vm0, %v300_v60, %v302_v19 }
  0x5c   :  { %v228_v25 = vclz %v933_v15  ;;  %v1310_v30 = vmul.u32.u64.low %v1272_v35, %v307_v17  ;;  %v1311_v45 = vmul.u32.u64.high %v1272_v35, %v307_v17, %v1310_v30  ;;  %vm379_vm2 = vcmp.gt.s32.totalorder %v378_v23, 0 }
  0x5d   :  { %v130_v21 = vshrl.u32 %v112_v53, %v128_v10  ;;  %v133_v31 = vadd.s32 127, %v132_v12  ;;  %vm58_vm3 = vcmp.lt.s32.totalorder %v1151_v4, 0  ;;  %v380_v46 = vsel %vm379_vm2, %v378_v23, 0 }
  0x5e   :  { %v934_v41 = vadd.s32 4294967294, %v228_v25  ;;  %v216_v47 = vadd.s32 %v1240_v61, %v1246_v0  ;;  %v375_v48 = vand.u32 8388607, %v368_v26  ;;  %v382_v49 = vand.u32 31, %v380_v46 }
  0x5f   :  { %v131_v27 = vor.u32 %v130_v21, %v129_v11  ;;  %v134_v33 = vshll.u32 %v133_v31, 23  ;;  %v319_v53 = vmul.u32 %v1272_v35, %v303_v14  ;;  %vm321_vm5 = vc.u32 %v1307_v39, %v1310_v30 }
  0x60   :  { %vm935_vm4 = vcmp.lt.s32.totalorder %v934_v41, 0  ;;  %v322_v58 = vadd.s32 1, %v1311_v45  ;;  %vm1326_vm6 = vcmp.le.f32.partialorder %v56_v7, 0.7853982  ;;  %v142_v59 = vsub.s32 4, %v1253_v32 }
  0x61   :  { %v135_v29 = vor.u32 4788187, %v134_v33  ;;  %v138_v16 = vcvt.s32.f32 %v131_v27  ;;  %v231_v52 = vsel %vm935_vm4, 0, %v934_v41  ;;  %v383_v60 = vsub.s32 32, %v382_v49 }
  0x62   :  { %v232_v54 = vsub.s32 32, %v231_v52  ;;  %v233_v55 = vshll.u32 %v1285_v57, %v231_v52  ;;  %v236_v56 = vsub.s32 4294967266, %v231_v52  ;;  %v323_v63 = vsel %vm321_vm5, %v322_v58, %v1311_v45 }
  0x63   :  { %v136_v51 = vand.u32 2147483647, %v135_v29  ;;  %v376_v1 = vor.u32 8388608, %v375_v48  ;;  %v324_v57 = vadd.s32 %v323_v63, %v319_v53  ;;  %v385_v19 = vshll.u32 %v1099_v34, %v382_v49 }
  0x64   :  { %v234_v35 = vshrl.u32 %v216_v47, %v232_v54  ;;  %v237_v62 = vadd.s32 127, %v236_v56  ;;  %v386_v8 = vshrl.u32 %v1100_v36, %v383_v60  ;;  %vm162_vm7 = vcmp.lt.s32.totalorder %v1154_v5, 0 }
  0x65   :  { %v139_v0 = vmul.f32 %v138_v16, %v136_v51  ;;  %v388_v10 = vshll.u32 %v1100_v36, %v382_v49  ;;  %v389_v11 = vshrl.u32 %v1101_v38, %v383_v60  ;;  %v143_v12 = vsel %vm58_vm3, %v142_v59, %v1253_v32  ;;  %v44_v59 = vld [vmem:[#allocation6 + $0x14] sm:$0xf] }
  0x66   :  { %v235_v7 = vor.u32 %v234_v35, %v233_v55  ;;  %v238_v44 = vshll.u32 %v237_v62, 23  ;;  %v325_v13 = vadd.s32 536870912, %v324_v57  ;;  %v381_v15 = vshrl.u32 %v380_v46, 5 }
  0x67   :  { %v140_v18 = vxor.u32 2147483648, %v139_v0  ;;  %v394_v17 = vshll.u32 %v1102_v40, %v382_v49  ;;  %v391_v31 = vshll.u32 %v1101_v38, %v382_v49  ;;  %v392_v22 = vshrl.u32 %v1102_v40, %v383_v60 }
  0x68   :  { %v239_v20 = vor.u32 4788187, %v238_v44  ;;  %v242_v21 = vcvt.s32.f32 %v235_v7  ;;  %vm1347_vm8 = vcmp.le.f32.partialorder %v160_v9, 0.7853982  ;;  %v326_v32 = vshrl.u32 %v325_v13, 30 }
  0x69   :  { %v141_v23 = vsel %vm58_vm3, %v140_v18, %v139_v0  ;;  %v387_v14 = vor.u32 %v386_v8, %v385_v19  ;;  %v395_v27 = vshrl.u32 %v1103_v42, %v383_v60  ;;  %v390_v37 = vor.u32 %v389_v11, %v388_v10 }
  0x6a   :  { %v240_v33 = vand.u32 2147483647, %v239_v20  ;;  %v397_v41 = vshll.u32 %v1103_v42, %v382_v49  ;;  %v398_v45 = vshrl.u32 %v1104_v50, %v383_v60  ;;  %v327_v29 = vshll.u32 %v326_v32, 30 }
  0x6b   :  { %v396_v16 = vor.u32 %v395_v27, %v394_v17  ;;  %vm400_vm9 = vcmp.lt.s32.totalorder %v381_v15, 1  ;;  %v1354_v46 = vshll.u32 %v376_v1, 8  ;;  %v144_v9 = vsel %vm1326_vm6, %v1151_v4, %v141_v23 }
  0x6c   :  { %v243_v47 = vmul.f32 %v242_v21, %v240_v33  ;;  %v384_v48 = vshrl.u32 %v1099_v34, %v383_v60  ;;  %v393_v51 = vor.u32 %v392_v22, %v391_v31  ;;  %v1360_v52 = vsub.s32 %v324_v57, %v327_v29 }
  0x6d   :  { %v399_v53 = vor.u32 %v398_v45, %v397_v41  ;;  %vm402_vm10 = vcmp.lt.s32.totalorder %v381_v15, 3  ;;  %vm403_vm11 = vcmp.lt.s32.totalorder %v381_v15, 4  ;;  %vm401_vm12 = vcmp.lt.s32.totalorder %v381_v15, 2 }
  0x6e   :  { %v244_v49 = vxor.u32 2147483648, %v243_v47  ;;  %v405_v54 = vsel %vm403_vm11, %v393_v51, 2102212464  ;;  %v408_v55 = vsel %vm400_vm9, %v387_v14, %v390_v37  ;;  %1003 = vcosq.f32 %v144_v9 }
  0x6f   :  { %v246_v56 = vsub.s32 4, %v1276_v43  ;;  %v330_v58 = vsub.s32 0, %v1360_v52  ;;  %v409_v0 = vsel %vm403_vm11, %v396_v16, 920167782  ;;  %v145_v60 = vsel %vm1326_vm6, 0, %v143_v12 }
  0x70   :  { %1005 = vsinq.f32 %v144_v9  ;;  %v404_v35 = vsel %vm400_vm9, %v384_v48, %v387_v14  ;;  %v410_v62 = vsel %vm402_vm10, %v393_v51, %v409_v0  ;;  %v245_v63 = vsel %vm162_vm7, %v244_v49, %v243_v47 }
  0x71   :  { %v937_v1 = vmin.u32 %v330_v58, %v1360_v52  ;;  %v406_v18 = vsel %vm402_vm10, %v390_v37, %v405_v54  ;;  %v411_v57 = vsel %vm401_vm12, %v408_v55, %v410_v62  ;;  %v412_v19 = vsel %vm400_vm9, %v390_v37, %v393_v51  ;;  %v46_v51 = vld [vmem:[#allocation6 + $0x1c] sm:$0xf] }
  0x72   :  { %v413_v8 = vsel %vm403_vm11, %v399_v53, 1326507024  ;;  %v1379_v61 = vmul.u32.u64.low %v1354_v46, %v411_v57  ;;  %v1380_v7 = vmul.u32.u64.high %v1354_v46, %v411_v57, %v1379_v61  ;;  %v1384_v44 = vadd.f32 %v1148_v3, %v44_v59 }
  0x73   :  { %v247_v10 = vsel %vm162_vm7, %v246_v56, %v1276_v43  ;;  %v332_v11 = vclz %v937_v1  ;;  %v350_v12 = vsub.s32 4, %v326_v32  ;;  %v248_v13 = vsel %vm1347_vm8, %v1154_v5, %v245_v63 }
  0x74   :  { %vm1394_vm13 = vcmp.le.f32.partialorder %v264_v28, 0.7853982  ;;  %vm266_vm14 = vcmp.lt.s32.totalorder %v1157_v6, 0  ;;  %v414_v20 = vsel %vm402_vm10, %v396_v16, %v413_v8  ;;  %v149_v21 = vadd.s32 3, %v145_v60 }
  0x75   :  { %v938_v31 = vadd.s32 4294967294, %v332_v11  ;;  %v407_v43 = vsel %vm401_vm12, %v404_v35, %v406_v18  ;;  %v415_v22 = vsel %vm401_vm12, %v412_v19, %v414_v20  ;;  %v249_v23 = vsel %vm1347_vm8, 0, %v247_v10 }
  0x76   :  { %v320_v14 = vadd.s32 %v1310_v30, %v1307_v39  ;;  %v1407_v28 = vmul.u32.u64.low %v1354_v46, %v415_v22  ;;  %v1408_v27 = vmul.u32.u64.high %v1354_v46, %v415_v22, %v1407_v28  ;;  %1007 = vcosq.f32 %v248_v13  ;;  %v45_v39 = vld [vmem:[#allocation6 + $0x18] sm:$0xf] }
  0x77   :  { %vm939_vm15 = vcmp.lt.s32.totalorder %v938_v31, 0  ;;  %v351_v33 = vsel %vm266_vm14, %v350_v12, %v326_v32  ;;  %v426_v37 = vadd.s32 1, %v1380_v7  ;;  %v423_v15 = vmul.u32 %v1354_v46, %v407_v43 }
  0x78   :  { %v335_v41 = vsel %vm939_vm15, 0, %v938_v31  ;;  %v472_v25 = vand.u32 2147483647, %v1301_v24  ;;  %v475_v45 = vand.u32 2139095040, %v1301_v24  ;;  %v1004_v29 = vpop.eup %1003  ;;  %v253_v30 = vadd.s32 3, %v249_v23 }
  0x79   :  { %v336_v16 = vsub.s32 32, %v335_v41  ;;  %v337_v9 = vshll.u32 %v1360_v52, %v335_v41  ;;  %v340_v47 = vsub.s32 4294967266, %v335_v41  ;;  %v1417_v53 = vand.u32 3, %v149_v21 }
  0x7a   :  { %v1006_v48 = vpop.eup %1005  ;;  %v353_v32 = vsel %vm1394_vm13, 0, %v351_v33  ;;  %vm425_vm0 = vc.u32 %v1408_v27, %v1379_v61  ;;  %v476_v46 = vshrl.u32 %v475_v45, 23  ;;  %1009 = vsinq.f32 %v248_v13 }
  0x7b   :  { %v338_v49 = vshrl.u32 %v320_v14, %v336_v16  ;;  %v341_v54 = vadd.s32 127, %v340_v47  ;;  %v427_v55 = vsel %vm425_vm0, %v426_v37, %v1380_v7  ;;  %v1425_v56 = vadd.f32 %v1148_v3, %v45_v39 }
  0x7c   :  { %v428_v52 = vadd.s32 %v427_v55, %v423_v15  ;;  %v944_v58 = vadd.s32 4294967169, %v476_v46  ;;  %v479_v0 = vand.u32 8388607, %v472_v25  ;;  %v1430_v59 = vadd.f32 %v1148_v3, %v46_v51 }
  0x7d   :  { %v1432_v60 = vand.u32 3, %v253_v30  ;;  %v339_v35 = vor.u32 %v338_v49, %v337_v9  ;;  %v342_v62 = vshll.u32 %v341_v54, 23  ;;  %v156_v63 = vxor.u32 2147483648, %v1004_v29 }
  0x7e   :  { %v357_v1 = vadd.s32 3, %v353_v32  ;;  %v429_v18 = vadd.s32 536870912, %v428_v52  ;;  %v482_v57 = vadd.s32 1, %v944_v58  ;;  %v153_v19 = vxor.u32 2147483648, %v1006_v48 }
  0x7f   :  { %vm155_vm1 = vcmp.eq.s32.totalorder %v1417_v53, 2  ;;  %v343_v8 = vor.u32 4788187, %v342_v62  ;;  %v346_v7 = vcvt.s32.f32 %v339_v35  ;;  %vm152_vm2 = vcmp.eq.s32.totalorder %v1417_v53, 0 }
  0x80   :  { %v430_v10 = vshrl.u32 %v429_v18, 30  ;;  %v480_v11 = vor.u32 8388608, %v479_v0  ;;  %vm483_vm3 = vcmp.gt.s32.totalorder %v482_v57, 0  ;;  %v1436_v3 = vpop.eup %1007  ;;  %vm370_vm4 = vcmp.lt.s32.totalorder %v1251_v2, 0 }
  0x81   :  { %v344_v12 = vand.u32 2147483647, %v343_v8  ;;  %v484_v13 = vsel %vm483_vm3, %v482_v57, 0  ;;  %v579_v20 = vand.u32 2139095040, %v1384_v44  ;;  %v1440_v21 = vsel %vm155_vm1, %v156_v63, %v1006_v48 }
  0x82   :  { %vm259_vm5 = vcmp.eq.s32.totalorder %v1432_v60, 2  ;;  %v1443_v31 = vand.u32 3, %v357_v1  ;;  %v431_v43 = vshll.u32 %v430_v10, 30  ;;  %v1445_v22 = vsel %vm152_vm2, %v1004_v29, %v153_v19 }
  0x83   :  { %v347_v23 = vmul.f32 %v346_v7, %v344_v12  ;;  %v424_v14 = vadd.s32 %v1379_v61, %v1408_v27  ;;  %v486_v28 = vand.u32 31, %v484_v13  ;;  %v260_v33 = vxor.u32 2147483648, %v1436_v3 }
  0x84   :  { %v1450_v37 = vsub.s32 %v428_v52, %v431_v43  ;;  %v1452_v41 = vshll.u32 %v480_v11, 8  ;;  %v576_v15 = vand.u32 2147483647, %v1384_v44  ;;  %v1455_v45 = vpop.eup %1009  ;;  %v454_v30 = vsub.s32 4, %v430_v10 }
  0x85   :  { %v348_v39 = vxor.u32 2147483648, %v347_v23  ;;  %v487_v16 = vsub.s32 32, %v486_v28  ;;  %v580_v29 = vshrl.u32 %v579_v20, 23  ;;  %v485_v47 = vshrl.u32 %v484_v13, 5 }
  0x86   :  { %v434_v9 = vsub.s32 0, %v1450_v37  ;;  %v489_v61 = vshll.u32 %v1099_v34, %v486_v28  ;;  %v492_v27 = vshll.u32 %v1100_v36, %v486_v28  ;;  %v495_v46 = vshll.u32 %v1101_v38, %v486_v28 }
  0x87   :  { %v349_v48 = vsel %vm266_vm14, %v348_v39, %v347_v23  ;;  %v490_v51 = vshrl.u32 %v1100_v36, %v487_v16  ;;  %v493_v32 = vshrl.u32 %v1101_v38, %v487_v16  ;;  %v257_v49 = vxor.u32 2147483648, %v1455_v45 }
  0x88   :  { %v1469_v54 = vsel %vm259_vm5, %v260_v33, %v1455_v45  ;;  %v941_v55 = vmin.u32 %v434_v9, %v1450_v37  ;;  %v496_v52 = vshrl.u32 %v1102_v40, %v487_v16  ;;  %v352_v58 = vsel %vm1394_vm13, %v1157_v6, %v349_v48 }
  0x89   :  { %v488_v0 = vshrl.u32 %v1099_v34, %v487_v16  ;;  %v498_v35 = vshll.u32 %v1102_v40, %v486_v28  ;;  %v948_v62 = vadd.s32 4294967169, %v580_v29  ;;  %vm256_vm6 = vcmp.eq.s32.totalorder %v1432_v60, 0 }
  0x8a   :  { %v436_v63 = vclz %v941_v55  ;;  %v455_v1 = vsel %vm370_vm4, %v454_v30, %v430_v10  ;;  %v491_v18 = vor.u32 %v490_v51, %v489_v61  ;;  %v494_v57 = vor.u32 %v493_v32, %v492_v27 }
  0x8b   :  { %v497_v19 = vor.u32 %v496_v52, %v495_v46  ;;  %v499_v8 = vshrl.u32 %v1103_v42, %v487_v16  ;;  %v501_v7 = vshll.u32 %v1103_v42, %v486_v28  ;;  %vm504_vm7 = vcmp.lt.s32.totalorder %v485_v47, 1 }
  0x8c   :  { %1011 = vcosq.f32 %v352_v58  ;;  %vm1485_vm8 = vcmp.le.f32.partialorder %v368_v26, 0.7853982  ;;  %v942_v11 = vadd.s32 4294967294, %v436_v63  ;;  %v502_v12 = vshrl.u32 %v1104_v50, %v487_v16 }
  0x8d   :  { %vm507_vm9 = vcmp.lt.s32.totalorder %v485_v47, 4  ;;  %v500_v10 = vor.u32 %v499_v8, %v498_v35  ;;  %vm505_vm10 = vcmp.lt.s32.totalorder %v485_v47, 2  ;;  %vm506_vm11 = vcmp.lt.s32.totalorder %v485_v47, 3 }
  0x8e   :  { %v508_v13 = vsel %vm504_vm7, %v488_v0, %v491_v18  ;;  %vm943_vm12 = vcmp.lt.s32.totalorder %v942_v11, 0  ;;  %v503_v20 = vor.u32 %v502_v12, %v501_v7  ;;  %v509_v43 = vsel %vm507_vm9, %v497_v19, 2102212464 }
  0x8f   :  { %v512_v23 = vsel %vm504_vm7, %v491_v18, %v494_v57  ;;  %v439_v28 = vsel %vm943_vm12, 0, %v942_v11  ;;  %v513_v26 = vsel %vm507_vm9, %v500_v10, 920167782  ;;  %v516_v33 = vsel %vm504_vm7, %v494_v57, %v497_v19 }
  0x90   :  { %v586_v45 = vadd.s32 1, %v948_v62  ;;  %v440_v39 = vsub.s32 32, %v439_v28  ;;  %v441_v30 = vshll.u32 %v1450_v37, %v439_v28  ;;  %v444_v16 = vsub.s32 4294967266, %v439_v28 }
  0x91   :  { %v514_v29 = vsel %vm506_vm11, %v497_v19, %v513_v26  ;;  %v510_v9 = vsel %vm506_vm11, %v494_v57, %v509_v43  ;;  %v517_v27 = vsel %vm507_vm9, %v503_v20, 1326507024  ;;  %v1509_v0 = vand.u32 8388607, %v576_v15 }
  0x92   :  { %v515_v61 = vsel %vm505_vm10, %v512_v23, %v514_v29  ;;  %vm587_vm13 = vcmp.gt.s32.totalorder %v586_v45, 0  ;;  %v442_v48 = vshrl.u32 %v424_v14, %v440_v39  ;;  %v445_v51 = vadd.s32 127, %v444_v16 }
  0x93   :  { %v518_v32 = vsel %vm506_vm11, %v500_v10, %v517_v27  ;;  %v588_v46 = vsel %vm587_vm13, %v586_v45, 0  ;;  %v1503_v52 = vmul.u32.u64.low %v1452_v41, %v515_v61  ;;  %v1504_v37 = vmul.u32.u64.high %v1452_v41, %v515_v61, %v1503_v52 }
  0x94   :  { %v519_v55 = vsel %vm505_vm10, %v516_v33, %v518_v32  ;;  %v443_v35 = vor.u32 %v442_v48, %v441_v30  ;;  %v446_v62 = vshll.u32 %v445_v51, 23  ;;  %v511_v63 = vsel %vm505_vm10, %v508_v13, %v510_v9 }
  0x95   :  { %v590_v14 = vand.u32 31, %v588_v46  ;;  %v1515_v18 = vsel %vm256_vm6, %v1436_v3, %v257_v49  ;;  %v457_v57 = vsel %vm1485_vm8, 0, %v455_v1  ;;  %1013 = vsinq.f32 %v352_v58 }
  0x96   :  { %v1520_v19 = vmul.u32.u64.low %v1452_v41, %v519_v55  ;;  %v1521_v8 = vmul.u32.u64.high %v1452_v41, %v519_v55, %v1520_v19  ;;  %v1523_v7 = vpop.eup %1011  ;;  %v447_v11 = vor.u32 4788187, %v446_v62  ;;  %v450_v12 = vcvt.s32.f32 %v443_v35 }
  0x97   :  { %v591_v47 = vsub.s32 32, %v590_v14  ;;  %v527_v10 = vmul.u32 %v1452_v41, %v511_v63  ;;  %v530_v13 = vadd.s32 1, %v1504_v37  ;;  %v593_v3 = vshll.u32 %v1099_v34, %v590_v14 }
  0x98   :  { %v596_v49 = vshll.u32 %v1100_v36, %v590_v14  ;;  %v448_v20 = vand.u32 2147483647, %v447_v11  ;;  %v1529_v1 = vadd.s32 3, %v457_v57  ;;  %v584_v43 = vor.u32 8388608, %v1509_v0 }
  0x99   :  { %v594_v23 = vshrl.u32 %v1100_v36, %v591_v47  ;;  %v364_v58 = vxor.u32 2147483648, %v1523_v7  ;;  %vm529_vm14 = vc.u32 %v1521_v8, %v1503_v52  ;;  %v589_v28 = vshrl.u32 %v588_v46, 5 }
  0x9a   :  { %v597_v41 = vshrl.u32 %v1101_v38, %v591_v47  ;;  %v451_v26 = vmul.f32 %v450_v12, %v448_v20  ;;  %v531_v33 = vsel %vm529_vm14, %v530_v13, %v1504_v37  ;;  %v599_v39 = vshll.u32 %v1101_v38, %v590_v14 }
  0x9b   :  { %v595_v45 = vor.u32 %v594_v23, %v593_v3  ;;  %v532_v30 = vadd.s32 %v531_v33, %v527_v10  ;;  %v600_v29 = vshrl.u32 %v1102_v40, %v591_v47  ;;  %v602_v9 = vshll.u32 %v1102_v40, %v590_v14 }
  0x9c   :  { %v598_v16 = vor.u32 %v597_v41, %v596_v49  ;;  %vm151_vm15 = vcmp.lt.s32.totalorder %v1417_v53, 2  ;;  %v452_v61 = vxor.u32 2147483648, %v451_v26  ;;  %v603_v27 = vshrl.u32 %v1103_v42, %v591_v47 }
  0x9d   :  { %v605_v48 = vshll.u32 %v1103_v42, %v590_v14  ;;  %v606_v51 = vshrl.u32 %v1104_v50, %v591_v47  ;;  %vm255_vm0 = vcmp.lt.s32.totalorder %v1432_v60, 2  ;;  %v533_v32 = vadd.s32 536870912, %v532_v30 }
  0x9e   :  { %v592_v46 = vshrl.u32 %v1099_v34, %v591_v47  ;;  %v601_v55 = vor.u32 %v600_v29, %v599_v39  ;;  %vm608_vm1 = vcmp.lt.s32.totalorder %v589_v28, 1  ;;  %v453_v37 = vsel %vm370_vm4, %v452_v61, %v451_v26 }
  0x9f   :  { %v604_v0 = vor.u32 %v603_v27, %v602_v9  ;;  %v607_v35 = vor.u32 %v606_v51, %v605_v48  ;;  %vm611_vm2 = vcmp.lt.s32.totalorder %v589_v28, 4  ;;  %v456_v62 = vsel %vm1485_vm8, %v1251_v2, %v453_v37  ;;  %v1014_v57 = vpop.eup %1013 }
  0xa0   :  { %v534_v63 = vshrl.u32 %v533_v32, 30  ;;  %vm610_vm3 = vcmp.lt.s32.totalorder %v589_v28, 3  ;;  %v613_v14 = vsel %vm611_vm2, %v601_v55, 2102212464  ;;  %vm148_vm5 = vweird.f32 %v1151_v4 }
  0xa1   :  { %vm252_vm6 = vweird.f32 %v1154_v5  ;;  %1015 = vcosq.f32 %v456_v62  ;;  %vm609_vm7 = vcmp.lt.s32.totalorder %v589_v28, 2  ;;  %v616_v19 = vsel %vm608_vm1, %v595_v45, %v598_v16 }
  0xa2   :  { %v617_v11 = vsel %vm611_vm2, %v604_v0, 920167782  ;;  %1017 = vsinq.f32 %v456_v62  ;;  %v535_v12 = vshll.u32 %v534_v63, 30  ;;  %v612_v17 = vsel %vm608_vm1, %v592_v46, %v595_v45 }
  0xa3   :  { %v614_v47 = vsel %vm610_vm3, %v598_v16, %v613_v14  ;;  %vm359_vm4 = vcmp.lt.s32.totalorder %v1443_v31, 2  ;;  %v618_v10 = vsel %vm610_vm3, %v601_v55, %v617_v11  ;;  %v620_v13 = vsel %vm608_vm1, %v598_v16, %v601_v55 }
  0xa4   :  { %v621_v3 = vsel %vm611_vm2, %v607_v35, 1326507024  ;;  %v624_v49 = vshll.u32 %v584_v43, 8  ;;  %v1563_v20 = vsub.s32 %v532_v30, %v535_v12  ;;  %v558_v23 = vsub.s32 4, %v534_v63 }
  0xa5   :  { %v619_v41 = vsel %vm609_vm7, %v616_v19, %v618_v10  ;;  %v622_v26 = vsel %vm610_vm3, %v604_v0, %v621_v3  ;;  %v361_v33 = vxor.u32 2147483648, %v1014_v57  ;;  %v615_v16 = vsel %vm609_vm7, %v612_v17, %v614_v47 }
  0xa6   :  { %v623_v45 = vsel %vm609_vm7, %v620_v13, %v622_v26  ;;  %v1568_v39 = vmul.u32.u64.low %v624_v49, %v619_v41  ;;  %v1569_v29 = vmul.u32.u64.high %v624_v49, %v619_v41, %v1568_v39  ;;  %v538_v9 = vsub.s32 0, %v1563_v20 }
  0xa7   :  { %v1573_v61 = vmul.u32.u64.low %v624_v49, %v623_v45  ;;  %v1574_v27 = vmul.u32.u64.high %v624_v49, %v623_v45, %v1573_v61  ;;  %vm360_vm8 = vcmp.eq.s32.totalorder %v1443_v31, 0  ;;  %vm363_vm9 = vcmp.eq.s32.totalorder %v1443_v31, 2 }
  0xa8   :  { %vm474_vm10 = vcmp.lt.s32.totalorder %v1301_v24, 0  ;;  %v680_v43 = vand.u32 2147483647, %v1425_v56  ;;  %v158_v30 = vsel %vm151_vm15, %v1445_v22, %v1440_v21  ;;  %v945_v48 = vmin.u32 %v538_v9, %v1563_v20 }
  0xa9   :  { %v559_v28 = vsel %vm474_vm10, %v558_v23, %v534_v63  ;;  %v683_v51 = vand.u32 2139095040, %v1425_v56  ;;  %v262_v32 = vsel %vm255_vm0, %v1515_v18, %v1469_v54  ;;  %v1593_v46 = vand.u32 3, %v1529_v1 }
  0xaa   :  { %v631_v55 = vmul.u32 %v624_v49, %v615_v16  ;;  %v634_v37 = vadd.s32 1, %v1569_v29  ;;  %v362_v53 = vsel %vm360_vm8, %v1523_v7, %v361_v33  ;;  %v365_v21 = vsel %vm363_vm9, %v364_v58, %v1014_v57 }
  0xab   :  { %vm1601_vm11 = vcmp.le.f32.partialorder %v472_v25, 0.7853982  ;;  %v540_v0 = vclz %v945_v48  ;;  %v1016_v60 = vpop.eup %1015  ;;  %vm633_vm12 = vc.u32 %v1574_v27, %v1568_v39  ;;  %v684_v18 = vshrl.u32 %v683_v51, 23 }
  0xac   :  { %v561_v54 = vsel %vm1601_vm11, 0, %v559_v28  ;;  %v687_v1 = vand.u32 8388607, %v680_v43  ;;  %v1018_v35 = vpop.eup %1017  ;;  %v1612_v7 = vsel %vm148_vm5, nan, %v158_v30  ;;  %v1616_v25 = vsel %vm252_vm6, nan, %v262_v32 }
  0xad   :  { %v946_v58 = vadd.s32 4294967294, %v540_v0  ;;  %v635_v62 = vsel %vm633_vm12, %v634_v37, %v1569_v29  ;;  %vm464_vm13 = vcmp.eq.s32.totalorder %v1593_v46, 0  ;;  %vm467_vm14 = vcmp.eq.s32.totalorder %v1593_v46, 2 }
  0xae   :  { %v636_v63 = vadd.s32 %v635_v62, %v631_v55  ;;  %v952_v14 = vadd.s32 4294967169, %v684_v18  ;;  %v1623_v57 = vsel %vm359_vm4, %v362_v53, %v365_v21  ;;  %v528_v4 = vadd.s32 %v1503_v52, %v1521_v8 }
  0xaf   :  { %vm947_vm15 = vcmp.lt.s32.totalorder %v946_v58, 0  ;;  %v565_v5 = vadd.s32 3, %v561_v54  ;;  %v688_v12 = vor.u32 8388608, %v687_v1  ;;  %v468_v47 = vxor.u32 2147483648, %v1016_v60 }
  0xb0   :  { %v543_v19 = vsel %vm947_vm15, 0, %v946_v58  ;;  %v637_v11 = vadd.s32 536870912, %v636_v63  ;;  %v690_v17 = vadd.s32 1, %v952_v14  ;;  %v465_v49 = vxor.u32 2147483648, %v1018_v35 }
  0xb1   :  { %v544_v10 = vsub.s32 32, %v543_v19  ;;  %v545_v13 = vshll.u32 %v1563_v20, %v543_v19  ;;  %v548_v3 = vsub.s32 4294967266, %v543_v19  ;;  %vm578_vm0 = vcmp.lt.s32.totalorder %v1384_v44, 0 }
  0xb2   :  { %v638_v31 = vshrl.u32 %v637_v11, 30  ;;  %vm691_vm1 = vcmp.gt.s32.totalorder %v690_v17, 0  ;;  %v787_v23 = vand.u32 2139095040, %v1430_v59  ;;  %v784_v26 = vand.u32 2147483647, %v1430_v59 }
  0xb3   :  { %v546_v41 = vshrl.u32 %v528_v4, %v544_v10  ;;  %v549_v52 = vadd.s32 127, %v548_v3  ;;  %v692_v8 = vsel %vm691_vm1, %v690_v17, 0  ;;  %v1631_v33 = vand.u32 3, %v565_v5 }
  0xb4   :  { %v1634_v45 = vadd.s32 %v1568_v39, %v1574_v27  ;;  %v639_v29 = vshll.u32 %v638_v31, 30  ;;  %v694_v20 = vand.u32 31, %v692_v8  ;;  %v1638_v9 = vsel %vm467_vm14, %v468_v47, %v1018_v35 }
  0xb5   :  { %v547_v16 = vor.u32 %v546_v41, %v545_v13  ;;  %v550_v61 = vshll.u32 %v549_v52, 23  ;;  %v1640_v30 = vshll.u32 %v688_v12, 8  ;;  %v1644_v48 = vsel %vm464_vm13, %v1016_v60, %v465_v49 }
  0xb6   :  { %v1646_v28 = vsub.s32 %v636_v63, %v639_v29  ;;  %v695_v51 = vsub.s32 32, %v694_v20  ;;  %v788_v32 = vshrl.u32 %v787_v23, 23  ;;  %v662_v55 = vsub.s32 4, %v638_v31 }
  0xb7   :  { %v551_v39 = vor.u32 4788187, %v550_v61  ;;  %v554_v27 = vcvt.s32.f32 %v547_v16  ;;  %v1650_v37 = vand.u32 8388607, %v784_v26  ;;  %v697_v21 = vshll.u32 %v1099_v34, %v694_v20 }
  0xb8   :  { %v642_v53 = vsub.s32 0, %v1646_v28  ;;  %v698_v0 = vshrl.u32 %v1100_v36, %v695_v51  ;;  %v700_v60 = vshll.u32 %v1100_v36, %v694_v20  ;;  %v701_v18 = vshrl.u32 %v1101_v38, %v695_v51 }
  0xb9   :  { %v552_v54 = vand.u32 2147483647, %v551_v39  ;;  %v703_v1 = vshll.u32 %v1101_v38, %v694_v20  ;;  %v704_v35 = vshrl.u32 %v1102_v40, %v695_v51  ;;  %vm1661_vm2 = vcmp.le.f32.partialorder %v576_v15, 0.7853982 }
  0xba   :  { %v949_v62 = vmin.u32 %v642_v53, %v1646_v28  ;;  %v693_v63 = vshrl.u32 %v692_v8, 5  ;;  %v706_v14 = vshll.u32 %v1102_v40, %v694_v20  ;;  %v956_v4 = vadd.s32 4294967169, %v788_v32 }
  0xbb   :  { %v555_v5 = vmul.f32 %v554_v27, %v552_v54  ;;  %v663_v19 = vsel %vm578_vm0, %v662_v55, %v638_v31  ;;  %v696_v11 = vshrl.u32 %v1099_v34, %v695_v51  ;;  %v707_v12 = vshrl.u32 %v1103_v42, %v695_v51 }
  0xbc   :  { %vm356_vm3 = vweird.f32 %v1157_v6  ;;  %vm463_vm5 = vcmp.lt.s32.totalorder %v1593_v46, 2  ;;  %v644_v15 = vclz %v949_v62  ;;  %v699_v17 = vor.u32 %v698_v0, %v697_v21 }
  0xbd   :  { %v702_v47 = vor.u32 %v701_v18, %v700_v60  ;;  %v705_v10 = vor.u32 %v704_v35, %v703_v1  ;;  %v556_v13 = vxor.u32 2147483648, %v555_v5  ;;  %v708_v3 = vor.u32 %v707_v12, %v706_v14 }
  0xbe   :  { %v709_v49 = vshll.u32 %v1103_v42, %v694_v20  ;;  %v710_v23 = vshrl.u32 %v1104_v50, %v695_v51  ;;  %v950_v41 = vadd.s32 4294967294, %v644_v15  ;;  %vm712_vm6 = vcmp.lt.s32.totalorder %v693_v63, 1 }
  0xbf   :  { %vm713_vm7 = vcmp.lt.s32.totalorder %v693_v63, 2  ;;  %vm714_vm4 = vcmp.lt.s32.totalorder %v693_v63, 3  ;;  %v557_v31 = vsel %vm474_vm10, %v556_v13, %v555_v5  ;;  %vm715_vm8 = vcmp.lt.s32.totalorder %v693_v63, 4 }
  0xc0   :  { %v711_v52 = vor.u32 %v710_v23, %v709_v49  ;;  %v716_v8 = vsel %vm712_vm6, %v696_v11, %v699_v17  ;;  %vm460_vm9 = vweird.f32 %v1251_v2  ;;  %v560_v29 = vsel %vm1601_vm11, %v1301_v24, %v557_v31 }
  0xc1   :  { %vm951_vm12 = vcmp.lt.s32.totalorder %v950_v41, 0  ;;  %v717_v20 = vsel %vm715_vm8, %v705_v10, 2102212464  ;;  %v720_v16 = vsel %vm712_vm6, %v699_v17, %v702_v47  ;;  %1019 = vcosq.f32 %v560_v29 }
  0xc2   :  { %v647_v61 = vsel %vm951_vm12, 0, %v950_v41  ;;  %v718_v51 = vsel %vm714_vm4, %v702_v47, %v717_v20  ;;  %v721_v32 = vsel %vm715_vm8, %v708_v3, 920167782  ;;  %1021 = vsinq.f32 %v560_v29 }
  0xc3   :  { %v648_v39 = vsub.s32 32, %v647_v61  ;;  %v649_v27 = vshll.u32 %v1646_v28, %v647_v61  ;;  %v652_v55 = vsub.s32 4294967266, %v647_v61  ;;  %v665_v22 = vsel %vm1661_vm2, 0, %v663_v19 }
  0xc4   :  { %v722_v53 = vsel %vm714_vm4, %v705_v10, %v721_v32  ;;  %v724_v21 = vsel %vm712_vm6, %v702_v47, %v705_v10  ;;  %v725_v0 = vsel %vm715_vm8, %v711_v52, 1326507024  ;;  %v719_v35 = vsel %vm713_vm7, %v716_v8, %v718_v51 }
  0xc5   :  { %v650_v60 = vshrl.u32 %v1634_v45, %v648_v39  ;;  %v653_v54 = vadd.s32 127, %v652_v55  ;;  %v723_v18 = vsel %vm713_vm7, %v720_v16, %v722_v53  ;;  %v726_v1 = vsel %vm714_vm4, %v708_v3, %v725_v0 }
  0xc6   :  { %v727_v28 = vsel %vm713_vm7, %v724_v21, %v726_v1  ;;  %v1700_v62 = vmul.u32.u64.low %v1640_v30, %v723_v18  ;;  %v1701_v14 = vmul.u32.u64.high %v1640_v30, %v723_v18, %v1700_v62  ;;  %v367_v12 = vsel %vm356_vm3, nan, %v1623_v57 }
  0xc7   :  { %v651_v5 = vor.u32 %v650_v60, %v649_v27  ;;  %v654_v19 = vshll.u32 %v653_v54, 23  ;;  %v1705_v11 = vmul.u32.u64.low %v1640_v30, %v727_v28  ;;  %v1706_v45 = vmul.u32.u64.high %v1640_v30, %v727_v28, %v1705_v11 }
  0xc8   :  { %v470_v63 = vsel %vm463_vm5, %v1644_v48, %v1638_v9  ;;  %v669_v15 = vadd.s32 3, %v665_v22  ;;  %v794_v17 = vadd.s32 1, %v956_v4  ;;  %v735_v13 = vmul.u32 %v1640_v30, %v719_v35 }
  0xc9   :  { %v655_v47 = vor.u32 4788187, %v654_v19  ;;  %v658_v10 = vcvt.s32.f32 %v651_v5  ;;  %v792_v3 = vor.u32 8388608, %v1650_v37  ;;  %vm568_vm10 = vcmp.eq.s32.totalorder %v1631_v33, 0 }
  0xca   :  { %v738_v49 = vadd.s32 1, %v1701_v14  ;;  %vm795_vm11 = vcmp.gt.s32.totalorder %v794_v17, 0  ;;  %v1720_v6 = vstv %s1684_s1  ;;  %vm567_vm13 = vcmp.lt.s32.totalorder %v1631_v33, 2 }
  0xcb   :  { %vm571_vm14 = vcmp.eq.s32.totalorder %v1631_v33, 2  ;;  %v656_v46 = vand.u32 2147483647, %v655_v47  ;;  %vm737_vm15 = vc.u32 %v1706_v45, %v1700_v62  ;;  %v796_v57 = vsel %vm795_vm11, %v794_v17, 0  ;;  %v1020_v9 = vpop.eup %1019 }
  0xcc   :  { %v471_v30 = vsel %vm460_vm9, nan, %v470_v63  ;;  %v1728_v48 = vand.u32 3, %v669_v15  ;;  %v739_v37 = vsel %vm737_vm15, %v738_v49, %v1701_v14  ;;  %v798_v4 = vand.u32 31, %v796_v57  ;;  %v1022_v23 = vpop.eup %1021 }
  0xcd   :  { %v659_v41 = vmul.f32 %v658_v10, %v656_v46  ;;  %v740_v31 = vadd.s32 %v739_v37, %v735_v13  ;;  %v1731_v52 = vshll.u32 %v792_v3, 8  ;;  %v1735_v8 = vmul.f32 %v1720_v6, %v1612_v7 }
  0xce   :  { %v569_v29 = vxor.u32 2147483648, %v1022_v23  ;;  %v572_v20 = vxor.u32 2147483648, %v1020_v9  ;;  %v799_v16 = vsub.s32 32, %v798_v4  ;;  %v1739_v2 = vmul.f32 %v1720_v6, %v1616_v25 }
  0xcf   :  { %vm564_vm1 = vweird.f32 %v1301_v24  ;;  %v660_v61 = vxor.u32 2147483648, %v659_v41  ;;  %v741_v51 = vadd.s32 536870912, %v740_v31  ;;  %v801_v32 = vshll.u32 %v1099_v34, %v798_v4 }
  0xd0   :  { %v804_v39 = vshll.u32 %v1100_v36, %v798_v4  ;;  %v797_v27 = vshrl.u32 %v796_v57, 5  ;;  %v802_v55 = vshrl.u32 %v1100_v36, %v799_v16  ;;  %v805_v7 = vshrl.u32 %v1101_v38, %v799_v16 }
  0xd1   :  { %v891_v22 = vmul.f32 %v1720_v6, %v367_v12  ;;  %v661_v53 = vsel %vm578_vm0, %v660_v61, %v659_v41  ;;  %v1749_v25 = vshrl.u32 %v741_v51, 30  ;;  %v807_v21 = vshll.u32 %v1101_v38, %v798_v4 }
  0xd2   :  { %v808_v0 = vshrl.u32 %v1102_v40, %v799_v16  ;;  %v570_v60 = vsel %vm568_vm10, %v1020_v9, %v569_v29  ;;  %v573_v54 = vsel %vm571_vm14, %v572_v20, %v1022_v23  ;;  %v664_v36 = vsel %vm1661_vm2, %v1384_v44, %v661_v53 }
  0xd3   :  { %v800_v18 = vshrl.u32 %v1099_v34, %v799_v16  ;;  %1023 = vcosq.f32 %v664_v36  ;;  %v743_v1 = vshll.u32 %v1749_v25, 30  ;;  %v803_v35 = vor.u32 %v802_v55, %v801_v32 }
  0xd4   :  { %v806_v28 = vor.u32 %v805_v7, %v804_v39  ;;  %1025 = vsinq.f32 %v664_v36  ;;  %v810_v38 = vshll.u32 %v1102_v40, %v798_v4  ;;  %v811_v14 = vshrl.u32 %v1103_v42, %v799_v16 }
  0xd5   :  { %v813_v5 = vshll.u32 %v1103_v42, %v798_v4  ;;  %v1765_v19 = vsub.s32 %v740_v31, %v743_v1  ;;  %v809_v11 = vor.u32 %v808_v0, %v807_v21  ;;  %v814_v58 = vshrl.u32 %v1104_v50, %v799_v16 }
  0xd6   :  { %vm816_vm0 = vcmp.lt.s32.totalorder %v797_v27, 1  ;;  %v574_v34 = vsel %vm567_vm13, %v570_v60, %v573_v54  ;;  %v812_v12 = vor.u32 %v811_v14, %v810_v38  ;;  %vm818_vm2 = vcmp.lt.s32.totalorder %v797_v27, 3 }
  0xd7   :  { %v892_v63 = vmul.f32 %v1720_v6, %v471_v30  ;;  %v746_v15 = vsub.s32 0, %v1765_v19  ;;  %v815_v40 = vor.u32 %v814_v58, %v813_v5  ;;  %vm817_vm3 = vcmp.lt.s32.totalorder %v797_v27, 2 }
  0xd8   :  { %vm819_vm5 = vcmp.lt.s32.totalorder %v797_v27, 4  ;;  %v824_v42 = vsel %vm816_vm0, %v803_v35, %v806_v28  ;;  %v897_v10 = vlaneseq  ;;  %v820_v13 = vsel %vm816_vm0, %v800_v18, %v803_v35 }
  0xd9   :  { %v821_v17 = vsel %vm819_vm5, %v809_v11, 2102212464  ;;  %v825_v47 = vsel %vm819_vm5, %v812_v12, 920167782  ;;  %v953_v50 = vmin.u32 %v746_v15, %v1765_v19  ;;  %v575_v49 = vsel %vm564_vm1, nan, %v574_v34 }
  0xda   :  { %v822_v33 = vsel %vm818_vm2, %v806_v28, %v821_v17  ;;  %v826_v3 = vsel %vm818_vm2, %v809_v11, %v825_v47  ;;  %v828_v57 = vsel %vm816_vm0, %v806_v28, %v809_v11  ;;  %v829_v9 = vsel %vm819_vm5, %v815_v40, 1326507024 }
  0xdb   :  { %v827_v46 = vsel %vm817_vm3, %v824_v42, %v826_v3  ;;  %vm668_vm6 = vweird.f32 %v1384_v44  ;;  %vm675_vm7 = vcmp.eq.s32.totalorder %v1728_v48, 2  ;;  %v748_v30 = vclz %v953_v50 }
  0xdc   :  { %v823_v37 = vsel %vm817_vm3, %v820_v13, %v822_v33  ;;  %v830_v4 = vsel %vm818_vm2, %v812_v12, %v829_v9  ;;  %v1786_v23 = vmul.u32.u64.low %v1731_v52, %v827_v46  ;;  %v1787_v41 = vmul.u32.u64.high %v1731_v52, %v827_v46, %v1786_v23 }
  0xdd   :  { %v1024_v24 = vpop.eup %1023  ;;  %v954_v31 = vadd.s32 4294967294, %v748_v30  ;;  %v831_v29 = vsel %vm817_vm3, %v828_v57, %v830_v4  ;;  %v893_v20 = vmul.f32 %v1720_v6, %v575_v49  ;;  %vm1792_vm4 = vcmp.lt.s32.totalorder %v897_v10, 512 }
  0xde   :  { %v1026_v61 = vpop.eup %1025  ;;  %vm672_vm8 = vcmp.eq.s32.totalorder %v1728_v48, 0  ;;  %v676_v51 = vxor.u32 2147483648, %v1024_v24  ;;  %v1798_v32 = vmul.u32.u64.low %v1731_v52, %v831_v29  ;;  %v1799_v39 = vmul.u32.u64.high %v1731_v52, %v831_v29, %v1798_v32  ;;  %901 = vst.msk [vmem:[#allocation7] sm:$0xf] %vm1792_vm4, %v1735_v8  ;;  %902 = vst.msk [vmem:[#allocation7 + $0x4] sm:$0xf] %vm1792_vm4, %v1739_v2 }
  0xdf   :  { %903 = vst.msk [vmem:[#allocation7 + $0x8] sm:$0xf] %vm1792_vm4, %v891_v22  ;;  %904 = vst.msk [vmem:[#allocation7 + $0xc] sm:$0xf] %vm1792_vm4, %v892_v63  ;;  %vm671_vm9 = vcmp.lt.s32.totalorder %v1728_v48, 2  ;;  %v673_v27 = vxor.u32 2147483648, %v1026_v61  ;;  %v736_v55 = vadd.s32 %v1700_v62, %v1706_v45  ;;  %v839_v7 = vmul.u32 %v1731_v52, %v823_v37 }
  0xe0   :  { %vm955_vm12 = vcmp.lt.s32.totalorder %v954_v31, 0  ;;  %905 = vst.msk [vmem:[#allocation7 + $0x10] sm:$0xf] %vm1792_vm4, %v893_v20  ;;  %v677_v8 = vsel %vm675_vm7, %v676_v51, %v1026_v61  ;;  %v842_v22 = vadd.s32 1, %v1787_v41  ;;  %vm841_vm10 = vc.u32 %v1799_v39, %v1786_v23 }
  0xe1   :  { %v751_v2 = vsel %vm955_vm12, 0, %v954_v31  ;;  %v674_v53 = vsel %vm672_vm8, %v1024_v24, %v673_v27  ;;  %v766_v44 = vsub.s32 4, %v1749_v25  ;;  %vm682_vm11 = vcmp.lt.s32.totalorder %v1425_v56, 0 }
  0xe2   :  { %v752_v21 = vsub.s32 32, %v751_v2  ;;  %v753_v0 = vshll.u32 %v1765_v19, %v751_v2  ;;  %v756_v60 = vsub.s32 4294967266, %v751_v2  ;;  %v678_v62 = vsel %vm671_vm9, %v674_v53, %v677_v8 }
  0xe3   :  { %v679_v45 = vsel %vm668_vm6, nan, %v678_v62  ;;  %v843_v52 = vsel %vm841_vm10, %v842_v22, %v1787_v41  ;;  %vm681_vm13 = vcmp.le.f32.partialorder %v680_v43, 0.7853982  ;;  %v767_v63 = vsel %vm682_vm11, %v766_v44, %v1749_v25 }
  0xe4   :  { %v754_v54 = vshrl.u32 %v736_v55, %v752_v21  ;;  %v757_v36 = vadd.s32 127, %v756_v60  ;;  %v844_v18 = vadd.s32 %v843_v52, %v839_v7  ;;  %v894_v1 = vmul.f32 %v1720_v6, %v679_v45 }
  0xe5   :  { %v769_v42 = vsel %vm681_vm13, 0, %v767_v63  ;;  %v840_v33 = vadd.s32 %v1786_v23, %v1799_v39  ;;  %vm772_vm2 = vweird.f32 %v1425_v56  ;;  %vm786_vm3 = vcmp.lt.s32.totalorder %v1430_v59, 0 }
  0xe6   :  { %v755_v48 = vor.u32 %v754_v54, %v753_v0  ;;  %v758_v35 = vshll.u32 %v757_v36, 23  ;;  %v845_v28 = vadd.s32 536870912, %v844_v18  ;;  %906 = vst.msk [vmem:[#allocation7 + $0x14] sm:$0xf] %vm1792_vm4, %v894_v1  ;;  %v773_v50 = vadd.s32 3, %v769_v42 }
  0xe7   :  { %vm785_vm5 = vcmp.le.f32.partialorder %v784_v26, 0.7853982  ;;  %vm876_vm9 = vweird.f32 %v1430_v59 }
  0xe8   :  { %v759_v38 = vor.u32 4788187, %v758_v35  ;;  %v762_v14 = vcvt.s32.f32 %v755_v48  ;;  %v846_v5 = vshrl.u32 %v845_v28, 30  ;;  %v774_v3 = vand.u32 3, %v773_v50 }
  0xea   :  { %v760_v19 = vand.u32 2147483647, %v759_v38  ;;  %v847_v11 = vshll.u32 %v846_v5, 30  ;;  %vm779_vm15 = vcmp.eq.s32.totalorder %v774_v3, 2  ;;  %vm776_vm1 = vcmp.eq.s32.totalorder %v774_v3, 0 }
  0xeb   :  { %vm775_vm0 = vcmp.lt.s32.totalorder %v774_v3, 2  ;;  %v870_v39 = vsub.s32 4, %v846_v5 }
  0xec   :  { %v763_v58 = vmul.f32 %v762_v14, %v760_v19  ;;  %v848_v34 = vsub.s32 %v844_v18, %v847_v11 }
  0xed   :  { %v871_v7 = vsel %vm786_vm3, %v870_v39, %v846_v5 }
  0xee   :  { %v764_v12 = vxor.u32 2147483648, %v763_v58  ;;  %v850_v15 = vsub.s32 0, %v848_v34  ;;  %v873_v53 = vsel %vm785_vm5, 0, %v871_v7 }
  0xef   :  { %v877_v21 = vadd.s32 3, %v873_v53 }
  0xf0   :  { %v765_v40 = vsel %vm682_vm11, %v764_v12, %v763_v58  ;;  %v957_v47 = vmin.u32 %v850_v15, %v848_v34 }
  0xf1   :  { %v768_v17 = vsel %vm681_vm13, %v1425_v56, %v765_v40  ;;  %v878_v0 = vand.u32 3, %v877_v21 }
  0xf2   :  { %1027 = vcosq.f32 %v768_v17  ;;  %v852_v10 = vclz %v957_v47 }
  0xf3   :  { %1029 = vsinq.f32 %v768_v17  ;;  %vm883_vm6 = vcmp.eq.s32.totalorder %v878_v0, 2  ;;  %vm880_vm7 = vcmp.eq.s32.totalorder %v878_v0, 0  ;;  %vm879_vm8 = vcmp.lt.s32.totalorder %v878_v0, 2 }
  0xf4   :  { %v958_v13 = vadd.s32 4294967294, %v852_v10 }
  0xf6   :  { %vm959_vm14 = vcmp.lt.s32.totalorder %v958_v13, 0 }
  0xf7   :  { %v855_v43 = vsel %vm959_vm14, 0, %v958_v13 }
  0xf8   :  { %v856_v49 = vsub.s32 32, %v855_v43  ;;  %v857_v46 = vshll.u32 %v848_v34, %v855_v43  ;;  %v860_v25 = vsub.s32 4294967266, %v855_v43 }
  0xfa   :  { %v858_v57 = vshrl.u32 %v840_v33, %v856_v49  ;;  %v861_v9 = vadd.s32 127, %v860_v25 }
  0xfc   :  { %v1028_v30 = vpop.eup %1027  ;;  %v859_v41 = vor.u32 %v858_v57, %v857_v46  ;;  %v862_v24 = vshll.u32 %v861_v9, 23 }
  0xfd   :  { %v1030_v37 = vpop.eup %1029  ;;  %v780_v4 = vxor.u32 2147483648, %v1028_v30 }
  0xfe   :  { %v777_v31 = vxor.u32 2147483648, %v1030_v37  ;;  %v863_v29 = vor.u32 4788187, %v862_v24  ;;  %v866_v20 = vcvt.s32.f32 %v859_v41 }
  0xff   :  { %v781_v23 = vsel %vm779_vm15, %v780_v4, %v1030_v37 }
 0x100   :  { %v778_v61 = vsel %vm776_vm1, %v1028_v30, %v777_v31  ;;  %v864_v32 = vand.u32 2147483647, %v863_v29 }
 0x101   :  { %v782_v51 = vsel %vm775_vm0, %v778_v61, %v781_v23 }
 0x102   :  { %v783_v27 = vsel %vm772_vm2, nan, %v782_v51  ;;  %v867_v55 = vmul.f32 %v866_v20, %v864_v32 }
 0x103   :  { %v895_v8 = vmul.f32 %v1720_v6, %v783_v27 }
 0x104   :  { %v868_v2 = vxor.u32 2147483648, %v867_v55 }
 0x105   :  { %907 = vst.msk [vmem:[#allocation7 + $0x18] sm:$0xf] %vm1792_vm4, %v895_v8 }
 0x106   :  { %v869_v56 = vsel %vm786_vm3, %v868_v2, %v867_v55 }
 0x107   :  { %v872_v22 = vsel %vm785_vm5, %v1430_v59, %v869_v56 }
 0x108   :  { %1031 = vcosq.f32 %v872_v22 }
 0x109   :  { %1033 = vsinq.f32 %v872_v22 }
 0x112   :  { %v1032_v60 = vpop.eup %1031 }
 0x113   :  { %v1034_v62 = vpop.eup %1033  ;;  %v884_v45 = vxor.u32 2147483648, %v1032_v60 }
 0x114   :  { %v881_v26 = vxor.u32 2147483648, %v1034_v62 }
 0x115   :  { %v885_v54 = vsel %vm883_vm6, %v884_v45, %v1034_v62 }
 0x116   :  { %v882_v36 = vsel %vm880_vm7, %v1032_v60, %v881_v26 }
 0x117   :  { %v886_v52 = vsel %vm879_vm8, %v882_v36, %v885_v54 }
 0x118   :  { %v887_v18 = vsel %vm876_vm9, nan, %v886_v52 }
 0x119   :  { %v896_v1 = vmul.f32 %v1720_v6, %v887_v18 }
 0x11b   :  { %908 = vst.msk [vmem:[#allocation7 + $0x1c] sm:$0xf] %vm1792_vm4, %v896_v1 }
 0x11c   :  { %913 = vsyncadd [#allocation4], 448  ;;  %s1105_s6 = smov [#allocation7]  }
 0x11d   :  { %s914_s7 = sshll.u32 %s1105_s6, 4  ;;  %s915_s7 = int_to_ptr.vmem [resolvable:$true] %s914_s7 }
 0x11e   :  { %s1067_s8 = scalar_lea.vmem %s915_s7, 64  ;;  %s1071_s9 = scalar_lea.vmem %s915_s7, 512 }
 0x11f   :  { %p1068_p11 = scmp.ne.s32.totalorder %s915_s7, %s1067_s8  ;;  %p1072_p12 = scmp.lt.s32.totalorder %s915_s7, %s915_s7 }
 0x120   :  { %p1073_p13 = scmp.lt.s32.totalorder %s1071_s9, %s1067_s8 }
 0x122   :  { %p1074_p0 = por %p1073_p13, %p1072_p12 }
 0x124   :  { %p1075_p1 = pnand %p1074_p0, %p1068_p11 }
 0x126   :  { %1078 = shalt.err (!%p1075_p1)
}
 0x127   :  { %s1079_s12 = scalar_lea.hbm %s1868_s2, 64 }
 0x128   :  { %p1080_p2 = scmp.ne.s32.totalorder %s1868_s2, %s1079_s12  ;;  %p1083_p3 = scmp.lt.u32.totalorder %s1079_s12, %s1868_s2 }
 0x12a   :  { %p1085_p4 = pnand %p1083_p3, %p1080_p2 }
 0x12c   :  { %1088 = shalt.err (!%p1085_p4)
}
 0x12d   :  { %920 = dma.vmem_to_hbm [thread:$0]  %s915_s7, 64, %s1868_s2, [#allocation4], %s1097_s29, %s1097_s29, %s1098_s30  }
 0x12e   :  { %1093 = dma.done.wait [#allocation4], 512  }
 0x12f   :  { %1094 = vsyncadd [#allocation4], 4294966784 }
 0x130   :  { %924 = vsyncpa [#allocation3], 1 }
 0x131   :  { %925 = vsyncpa [#allocation4], 1 }
 0x132   :  { %926 = vsyncpa [#allocation5], 1 }

</bundles_post_ra>
